<compile_context>
chip_gen: v7x
topology: tpu7x:2x2x1
jax: 0.10.0
libtpu: 0.0.40
codegen_flags: <defaults>
</compile_context>

<pallas_src>
import functools

import numpy as np

import jax
import jax.numpy as jnp
from jax.experimental import pallas as pl
from jax.experimental.pallas import tpu as pltpu


def make_divisible(v, divisor=8, min_value=None):
    min_value = min_value or divisor
    new_v = max(min_value, int(v + divisor / 2) // divisor * divisor)
    if new_v < 0.9 * v:
        new_v += divisor
    return new_v


def fold_bn(gamma, beta, mean, var, eps=1e-5):
    scale = gamma / jnp.sqrt(var + eps)
    bias = beta - mean * scale
    return scale, bias


def _ds_depthwise_separable_kernel(x_ref, wdw_ref, *rest, shifts, premultiplied,
                                   batch_tile, inv_s):
    """One grid step = one (batch_tile, Cin, S) block.

    premultiplied=True : wdw_ref is (KK, Cin, S)  -- mask already folded in.
    premultiplied=False: wdw_ref is (KK, Cin, 1) and the next ref is the
                         (KK, 1, S) zero-pad edge mask.
    """
    if premultiplied:
        (b1_ref, wredt_ref, bred_ref, wexp_ref, bexp_ref,
         wpw_ref, b2_ref, o_ref) = rest
        mask_ref = None
    else:
        (mask_ref, b1_ref, wredt_ref, bred_ref, wexp_ref, bexp_ref,
         wpw_ref, b2_ref, o_ref) = rest

    n_taps = len(shifts)

    # Hoist all weight loads (and the factored mask*weight products) out of the
    # per-image loop: computed once per grid step, reused for every image.
    if premultiplied:
        taps_w = [wdw_ref[k] for k in range(n_taps)]                 # (Cin, S)
    else:
        taps_w = [mask_ref[k] * wdw_ref[k] for k in range(n_taps)]   # (1,S)*(Cin,1)
    b1 = b1_ref[...]            # (Cin, 1)
    wredt = wredt_ref[...]      # (Cin, Cred)
    bred = bred_ref[...]        # (1, Cred)   (padding correction already folded in)
    wexp = wexp_ref[...]        # (Cin, Cred)
    bexp = bexp_ref[...]        # (Cin, 1)
    wpw = wpw_ref[...]          # (Cout, Cin) bf16, pre-cast host-side
    b2 = b2_ref[...]            # (Cout, 1)

    for b in range(batch_tile):                                      # static unroll
        xb = x_ref[b]                                                # (Cin, S) f32

        # ---- conv_dw (depthwise) + bn1 + ReLU ------------------------------
        # Each tap is an XLU lane-rotation of the flattened spatial axis; the
        # zero-pad edges (and any lane padding of S) are already zeros inside
        # the per-tap weight plane.
        def tap(k):
            sh = shifts[k]
            src = xb if sh == 0 else pltpu.roll(xb, shift=sh, axis=1)
            return src * taps_w[k]

        acc = tap(0)
        for k in range(1, n_taps):
            acc = acc + tap(k)
        z = jnp.maximum(acc + b1, 0.0)                               # (Cin, S)

        # ---- MultiHeadGate SE (sigmoid attention), VPU/XLU only ------------
        pooled = jnp.sum(z, axis=1, keepdims=True) * inv_s           # (Cin, 1)
        r = jnp.sum(wredt * pooled, axis=0, keepdims=True)           # (1, Cred)
        r = jnp.maximum(r + bred, 0.0)
        attn = jnp.sum(wexp * r, axis=1, keepdims=True)              # (Cin, 1)
        attn = jax.nn.sigmoid(attn + bexp)

        # ---- conv_pw (1x1) + bn2 + ReLU + residual --------------------------
        # bf16 MXU operands, f32 accumulation (documented mixed precision).
        zg = (z * attn).astype(jnp.bfloat16)
        out = jnp.dot(wpw, zg, preferred_element_type=jnp.float32)   # (Cout, S)
        out = jnp.maximum(out + b2, 0.0) + xb                        # residual
        o_ref[b] = out.astype(o_ref.dtype)


def ds_depthwise_separable(x_nchw, params, *, batch_tile=None,
                           premultiply_vmem_limit=4 * 1024 * 1024):
    """x_nchw: (N, Cin, H, W) float32. Returns (N, Cout, H, W)."""
    (w_dw, s1, b1, w_red, b_red, w_exp, b_exp, w_pw, s2, b2) = params
    N, Cin, H, W = x_nchw.shape
    KH, KW = int(w_dw.shape[1]), int(w_dw.shape[2])
    Cout = int(w_pw.shape[0])
    Cred = int(w_red.shape[0])
    S = H * W
    S_pad = ((S + 127) // 128) * 128          # keep the output block lane-dense
    n_pad = S_pad - S
    pad_h, pad_w = (KH - 1) // 2, (KW - 1) // 2

    # Only the stride-1, matching-channel residual path is lowered.
    if Cin != Cout:
        raise NotImplementedError("downsample path (Cin != Cout) is not lowered")

    # ---- batch tile: amortize per-grid-step overhead -------------------------
    if batch_tile is None:
        # Keep >=2 "parallel" grid steps so both v7x TensorCores get work
        # (near-neutral on single-TC v5e/v6e; pass batch_tile=N there to collapse
        # to a single step for minimum overhead).
        batch_tile = N // 2 if (N % 2 == 0 and N >= 2) else 1
    # Cap the x/out block size (double-buffered by the pipeline), snap to divisor.
    max_bt = max(1, (2 * 1024 * 1024) // (Cin * S_pad * 4))
    batch_tile = max(1, min(batch_tile, max_bt, N))
    while N % batch_tile:
        batch_tile -= 1
    num_steps = N // batch_tile

    # ---- host-side constant folding / layout prep (one-time weight prep) -----
    # bn1 scale -> depthwise weights; tap order k = kh*KW + kw.
    w_ch = jnp.transpose((w_dw * s1[:, None, None]).reshape(Cin, KH * KW))  # (KK,Cin)

    # Roll amounts and zero-pad edge masks per depthwise tap (padded lanes = 0).
    hh = np.arange(H)[:, None]
    ww = np.arange(W)[None, :]
    shifts, mask_rows = [], []
    for kh in range(KH):
        dh = kh - pad_h
        for kw in range(KW):
            dwo = kw - pad_w
            shifts.append((-(dh * W + dwo)) % S_pad)
            valid = ((hh + dh >= 0) & (hh + dh < H) &
                     (ww + dwo >= 0) & (ww + dwo < W))
            row = np.zeros((S_pad,), np.float32)
            row[:S] = valid.reshape(S).astype(np.float32)
            mask_rows.append(row)
    shifts = tuple(shifts)
    mask_arr = jnp.asarray(np.stack(mask_rows))                    # (KK, S_pad)

    table_bytes = KH * KW * Cin * S_pad * 4
    premultiplied = table_bytes <= premultiply_vmem_limit
    if premultiplied:
        # Fold the edge mask into the weights: one multiply per tap in-kernel.
        wdw_in = w_ch[:, :, None] * mask_arr[:, None, :]           # (KK, Cin, S_pad)
        dw_inputs = (wdw_in,)
    else:
        # Factored fallback for configs whose table would not fit v7x VMEM headroom.
        # TODO(synk): pre-broadcast the mask to 8 sublanes to avoid 1->8 padding.
        dw_inputs = (w_ch[:, :, None], mask_arr[:, None, :])

    b1_c = b1.reshape(Cin, 1)
    # Padded lanes of z equal relu(b1); fold the resulting avg-pool error into
    # the SE reduce bias so the kernel needs no in-kernel correction.
    bred_eff = b_red
    if n_pad:
        bred_eff = b_red - (n_pad / S) * (w_red @ jnp.maximum(b1, 0.0))
    bred_r = bred_eff.reshape(1, Cred)
    bexp_c = b_exp.reshape(Cin, 1)
    wred_t = jnp.transpose(w_red)                                  # (Cin, Cred)
    wpw_bf = (w_pw * s2[:, None]).astype(jnp.bfloat16)             # bn2 folded, pre-cast
    b2_c = b2.reshape(Cout, 1)

    x = x_nchw.reshape(N, Cin, S)            # metadata-only reshape (contiguous)
    if n_pad:
        x = jnp.pad(x, ((0, 0), (0, 0), (0, n_pad)))

    inputs = (x, *dw_inputs, b1_c, wred_t, bred_r, w_exp, bexp_c, wpw_bf, b2_c)

    def full_spec(a):
        nd = a.ndim
        return pl.BlockSpec(a.shape, lambda n, _nd=nd: (0,) * _nd)

    in_specs = [pl.BlockSpec((batch_tile, Cin, S_pad), lambda n: (n, 0, 0))]
    in_specs += [full_spec(a) for a in inputs[1:]]

    kernel = functools.partial(
        _ds_depthwise_separable_kernel,
        shifts=shifts, premultiplied=premultiplied,
        batch_tile=batch_tile, inv_s=1.0 / float(S))

    out = pl.pallas_call(
        kernel,
        out_shape=jax.ShapeDtypeStruct((N, Cout, S_pad), x_nchw.dtype),
        grid_spec=pltpu.PrefetchScalarGridSpec(
            num_scalar_prefetch=0,
            grid=(num_steps,),
            in_specs=in_specs,
            out_specs=pl.BlockSpec((batch_tile, Cout, S_pad), lambda n: (n, 0, 0)),
        ),
        compiler_params=pltpu.CompilerParams(
            dimension_semantics=("parallel",)),
    )(*inputs)

    if n_pad:
        out = out[:, :, :S]
    return out.reshape(N, Cout, H, W)


def ref_forward_nchw(x, params):
    """Pure-JAX reference (NCHW) mirroring the PyTorch forward."""
    (w_dw, s1, b1, w_red, b_red, w_exp, b_exp, w_pw, s2, b2) = params
    N, C, H, W = x.shape
    KH, KW = w_dw.shape[1], w_dw.shape[2]
    ph, pw = (KH - 1) // 2, (KW - 1) // 2
    xp = jnp.pad(x, ((0, 0), (0, 0), (ph, ph), (pw, pw)))
    acc = jnp.zeros_like(x)
    for kh in range(KH):
        for kw in range(KW):
            acc = acc + xp[:, :, kh:kh + H, kw:kw + W] * w_dw[:, kh, kw][None, :, None, None]
    y = jnp.maximum(acc * s1[None, :, None, None] + b1[None, :, None, None], 0.0)
    pooled = jnp.mean(y, axis=(2, 3))                          # (N, C)
    r = jnp.maximum(pooled @ w_red.T + b_red, 0.0)             # (N, Cred)
    attn = jax.nn.sigmoid(r @ w_exp.T + b_exp)                 # (N, C)
    yg = y * attn[:, :, None, None]
    out = jnp.einsum('oc,nchw->nohw', w_pw, yg)
    out = jnp.maximum(out * s2[None, :, None, None] + b2[None, :, None, None], 0.0)
    return out + x


if __name__ == "__main__":
    # Module config: in_channels_list=[8], out_channels_list=[8], kernel_size=3,
    # stride=1, se_ratio=0.25, has_gate=False, mode='largest', eval mode.
    N, C, H, W = 4, 8, 16, 16
    K = 3
    se_ratio = 0.25
    Cred = make_divisible(C * se_ratio, divisor=1)             # 2

    key = jax.random.PRNGKey(0)
    ks = jax.random.split(key, 16)

    def nrm(k, shape, scale=0.1):
        return jax.random.normal(k, shape, jnp.float32) * scale

    w_dw = nrm(ks[0], (C, K, K))                               # depthwise conv
    w_red = nrm(ks[1], (Cred, C))                              # SE reduce (1x1)
    b_red = nrm(ks[2], (Cred,))
    w_exp = nrm(ks[3], (C, Cred))                              # SE expand (1x1)
    b_exp = nrm(ks[4], (C,))
    w_pw = nrm(ks[5], (C, C))                                  # pointwise (Cout, Cin)

    # BatchNorm params (eval mode, folded into scale/bias).
    # Note: the PyTorch module zero-inits bn2.weight (init_residual_norm); a
    # nonzero gamma is used here so the full kernel path is exercised.
    def bn_params(k0, k1, k2, k3, c):
        gamma = 1.0 + nrm(k0, (c,))
        beta = nrm(k1, (c,))
        mean = nrm(k2, (c,))
        var = jnp.abs(nrm(k3, (c,))) + 1.0
        return fold_bn(gamma, beta, mean, var)

    s1, b1 = bn_params(ks[6], ks[7], ks[8], ks[9], C)
    s2, b2 = bn_params(ks[10], ks[11], ks[12], ks[13], C)

    params = (w_dw, s1, b1, w_red, b_red, w_exp, b_exp, w_pw, s2, b2)

    # Primary config: S = 256 (lane-dense), batch_tile = 2 -> 2 parallel grid steps.
    x_nchw = jax.random.normal(ks[14], (N, C, H, W), jnp.float32)
    out = jax.block_until_ready(ds_depthwise_separable(x_nchw, params))
    ref = ref_forward_nchw(x_nchw, params)
    max_err = float(jnp.max(jnp.abs(out - ref)))
    assert out.shape == (N, C, H, W)
    assert max_err < 5e-2, f"mismatch vs reference: {max_err}"

    # Secondary config: odd spatial size (S = 81 -> padded to 128) exercises the
    # lane-padding path and the folded avg-pool correction.
    x2 = jax.random.normal(ks[15], (2, C, 9, 9), jnp.float32)
    out2 = jax.block_until_ready(ds_depthwise_separable(x2, params))
    ref2 = ref_forward_nchw(x2, params)
    max_err2 = float(jnp.max(jnp.abs(out2 - ref2)))
    assert out2.shape == (2, C, 9, 9)
    assert max_err2 < 5e-2, f"mismatch vs reference (padded S): {max_err2}"

    print("KERNEL_OK")
</pallas_src>

<mosaic_0001>
module attributes {stable_mosaic.version = 11 : i64} {
  func.func @_ds_depthwise_separable_kernel(%arg0: i32, %arg1: memref<2x8x256xf32, #tpu.memory_space<vmem>>, %arg2: memref<9x8x256xf32, #tpu.memory_space<vmem>>, %arg3: memref<8x1xf32, #tpu.memory_space<vmem>>, %arg4: memref<8x2xf32, #tpu.memory_space<vmem>>, %arg5: memref<1x2xf32, #tpu.memory_space<vmem>>, %arg6: memref<8x2xf32, #tpu.memory_space<vmem>>, %arg7: memref<8x1xf32, #tpu.memory_space<vmem>>, %arg8: memref<8x8xbf16, #tpu.memory_space<vmem>>, %arg9: memref<8x1xf32, #tpu.memory_space<vmem>>, %arg10: memref<2x8x256xf32, #tpu.memory_space<vmem>>) attributes {dimension_semantics = [#tpu.dimension_semantics<parallel>], iteration_bounds = array<i64: 2>, scalar_prefetch = 0 : i64, scratch_operands = 0 : i64, tpu.core_type = #tpu.core_type<tc>, window_params = [{transform_indices = @transform_0, window_bounds = array<i64: 2, 8, 256>}, {pipeline_mode = #tpu.pipeline_mode<synchronous>, transform_indices = @transform_1, window_bounds = array<i64: 9, 8, 256>}, {pipeline_mode = #tpu.pipeline_mode<synchronous>, transform_indices = @transform_2, window_bounds = array<i64: 8, 1>}, {pipeline_mode = #tpu.pipeline_mode<synchronous>, transform_indices = @transform_3, window_bounds = array<i64: 8, 2>}, {pipeline_mode = #tpu.pipeline_mode<synchronous>, transform_indices = @transform_4, window_bounds = array<i64: 1, 2>}, {pipeline_mode = #tpu.pipeline_mode<synchronous>, transform_indices = @transform_5, window_bounds = array<i64: 8, 2>}, {pipeline_mode = #tpu.pipeline_mode<synchronous>, transform_indices = @transform_6, window_bounds = array<i64: 8, 1>}, {pipeline_mode = #tpu.pipeline_mode<synchronous>, transform_indices = @transform_7, window_bounds = array<i64: 8, 8>}, {pipeline_mode = #tpu.pipeline_mode<synchronous>, transform_indices = @transform_8, window_bounds = array<i64: 8, 1>}, {transform_indices = @transform_9, window_bounds = array<i64: 2, 8, 256>}]} {
    %c0 = arith.constant 0 : index
    %c0_0 = arith.constant 0 : index
    %c0_1 = arith.constant 0 : index
    %0 = vector.load %arg2[%c0, %c0_0, %c0_1] : memref<9x8x256xf32, #tpu.memory_space<vmem>>, vector<1x8x256xf32>
    %1 = vector.shape_cast %0 : vector<1x8x256xf32> to vector<8x256xf32>
    %c1 = arith.constant 1 : index
    %c0_2 = arith.constant 0 : index
    %c0_3 = arith.constant 0 : index
    %2 = vector.load %arg2[%c1, %c0_2, %c0_3] : memref<9x8x256xf32, #tpu.memory_space<vmem>>, vector<1x8x256xf32>
    %3 = vector.shape_cast %2 : vector<1x8x256xf32> to vector<8x256xf32>
    %c2 = arith.constant 2 : index
    %c0_4 = arith.constant 0 : index
    %c0_5 = arith.constant 0 : index
    %4 = vector.load %arg2[%c2, %c0_4, %c0_5] : memref<9x8x256xf32, #tpu.memory_space<vmem>>, vector<1x8x256xf32>
    %5 = vector.shape_cast %4 : vector<1x8x256xf32> to vector<8x256xf32>
    %c3 = arith.constant 3 : index
    %c0_6 = arith.constant 0 : index
    %c0_7 = arith.constant 0 : index
    %6 = vector.load %arg2[%c3, %c0_6, %c0_7] : memref<9x8x256xf32, #tpu.memory_space<vmem>>, vector<1x8x256xf32>
    %7 = vector.shape_cast %6 : vector<1x8x256xf32> to vector<8x256xf32>
    %c4 = arith.constant 4 : index
    %c0_8 = arith.constant 0 : index
    %c0_9 = arith.constant 0 : index
    %8 = vector.load %arg2[%c4, %c0_8, %c0_9] : memref<9x8x256xf32, #tpu.memory_space<vmem>>, vector<1x8x256xf32>
    %9 = vector.shape_cast %8 : vector<1x8x256xf32> to vector<8x256xf32>
    %c5 = arith.constant 5 : index
    %c0_10 = arith.constant 0 : index
    %c0_11 = arith.constant 0 : index
    %10 = vector.load %arg2[%c5, %c0_10, %c0_11] : memref<9x8x256xf32, #tpu.memory_space<vmem>>, vector<1x8x256xf32>
    %11 = vector.shape_cast %10 : vector<1x8x256xf32> to vector<8x256xf32>
    %c6 = arith.constant 6 : index
    %c0_12 = arith.constant 0 : index
    %c0_13 = arith.constant 0 : index
    %12 = vector.load %arg2[%c6, %c0_12, %c0_13] : memref<9x8x256xf32, #tpu.memory_space<vmem>>, vector<1x8x256xf32>
    %13 = vector.shape_cast %12 : vector<1x8x256xf32> to vector<8x256xf32>
    %c7 = arith.constant 7 : index
    %c0_14 = arith.constant 0 : index
    %c0_15 = arith.constant 0 : index
    %14 = vector.load %arg2[%c7, %c0_14, %c0_15] : memref<9x8x256xf32, #tpu.memory_space<vmem>>, vector<1x8x256xf32>
    %15 = vector.shape_cast %14 : vector<1x8x256xf32> to vector<8x256xf32>
    %c8 = arith.constant 8 : index
    %c0_16 = arith.constant 0 : index
    %c0_17 = arith.constant 0 : index
    %16 = vector.load %arg2[%c8, %c0_16, %c0_17] : memref<9x8x256xf32, #tpu.memory_space<vmem>>, vector<1x8x256xf32>
    %17 = vector.shape_cast %16 : vector<1x8x256xf32> to vector<8x256xf32>
    %c0_18 = arith.constant 0 : index
    %c0_19 = arith.constant 0 : index
    %18 = vector.load %arg3[%c0_18, %c0_19] : memref<8x1xf32, #tpu.memory_space<vmem>>, vector<8x1xf32>
    %c0_20 = arith.constant 0 : index
    %c0_21 = arith.constant 0 : index
    %19 = vector.load %arg4[%c0_20, %c0_21] : memref<8x2xf32, #tpu.memory_space<vmem>>, vector<8x2xf32>
    %c0_22 = arith.constant 0 : index
    %c0_23 = arith.constant 0 : index
    %20 = vector.load %arg5[%c0_22, %c0_23] : memref<1x2xf32, #tpu.memory_space<vmem>>, vector<1x2xf32>
    %c0_24 = arith.constant 0 : index
    %c0_25 = arith.constant 0 : index
    %21 = vector.load %arg6[%c0_24, %c0_25] : memref<8x2xf32, #tpu.memory_space<vmem>>, vector<8x2xf32>
    %c0_26 = arith.constant 0 : index
    %c0_27 = arith.constant 0 : index
    %22 = vector.load %arg7[%c0_26, %c0_27] : memref<8x1xf32, #tpu.memory_space<vmem>>, vector<8x1xf32>
    %c0_28 = arith.constant 0 : index
    %c0_29 = arith.constant 0 : index
    %23 = vector.load %arg8[%c0_28, %c0_29] : memref<8x8xbf16, #tpu.memory_space<vmem>>, vector<8x8xbf16>
    %c0_30 = arith.constant 0 : index
    %c0_31 = arith.constant 0 : index
    %24 = vector.load %arg9[%c0_30, %c0_31] : memref<8x1xf32, #tpu.memory_space<vmem>>, vector<8x1xf32>
    %c0_32 = arith.constant 0 : index
    %c0_33 = arith.constant 0 : index
    %c0_34 = arith.constant 0 : index
    %25 = vector.load %arg1[%c0_32, %c0_33, %c0_34] : memref<2x8x256xf32, #tpu.memory_space<vmem>>, vector<1x8x256xf32>
    %26 = vector.shape_cast %25 : vector<1x8x256xf32> to vector<8x256xf32>
    %c17_i32 = arith.constant 17 : i32
    %27 = tpu.dynamic_rotate %26 by %c17_i32 dim 1 : vector<8x256xf32>, i32 -> vector<8x256xf32>
    %28 = arith.mulf %27, %1 : vector<8x256xf32>
    %c16_i32 = arith.constant 16 : i32
    %29 = tpu.dynamic_rotate %26 by %c16_i32 dim 1 : vector<8x256xf32>, i32 -> vector<8x256xf32>
    %30 = arith.mulf %29, %3 : vector<8x256xf32>
    %31 = arith.addf %28, %30 : vector<8x256xf32>
    %c15_i32 = arith.constant 15 : i32
    %32 = tpu.dynamic_rotate %26 by %c15_i32 dim 1 : vector<8x256xf32>, i32 -> vector<8x256xf32>
    %33 = arith.mulf %32, %5 : vector<8x256xf32>
    %34 = arith.addf %31, %33 : vector<8x256xf32>
    %c1_i32 = arith.constant 1 : i32
    %35 = tpu.dynamic_rotate %26 by %c1_i32 dim 1 : vector<8x256xf32>, i32 -> vector<8x256xf32>
    %36 = arith.mulf %35, %7 : vector<8x256xf32>
    %37 = arith.addf %34, %36 : vector<8x256xf32>
    %38 = arith.mulf %26, %9 : vector<8x256xf32>
    %39 = arith.addf %37, %38 : vector<8x256xf32>
    %c255_i32 = arith.constant 255 : i32
    %40 = tpu.dynamic_rotate %26 by %c255_i32 dim 1 : vector<8x256xf32>, i32 -> vector<8x256xf32>
    %41 = arith.mulf %40, %11 : vector<8x256xf32>
    %42 = arith.addf %39, %41 : vector<8x256xf32>
    %c241_i32 = arith.constant 241 : i32
    %43 = tpu.dynamic_rotate %26 by %c241_i32 dim 1 : vector<8x256xf32>, i32 -> vector<8x256xf32>
    %44 = arith.mulf %43, %13 : vector<8x256xf32>
    %45 = arith.addf %42, %44 : vector<8x256xf32>
    %c240_i32 = arith.constant 240 : i32
    %46 = tpu.dynamic_rotate %26 by %c240_i32 dim 1 : vector<8x256xf32>, i32 -> vector<8x256xf32>
    %47 = arith.mulf %46, %15 : vector<8x256xf32>
    %48 = arith.addf %45, %47 : vector<8x256xf32>
    %c239_i32 = arith.constant 239 : i32
    %49 = tpu.dynamic_rotate %26 by %c239_i32 dim 1 : vector<8x256xf32>, i32 -> vector<8x256xf32>
    %50 = arith.mulf %49, %17 : vector<8x256xf32>
    %51 = arith.addf %48, %50 : vector<8x256xf32>
    %52 = vector.broadcast %18 : vector<8x1xf32> to vector<8x256xf32>
    %53 = arith.addf %51, %52 : vector<8x256xf32>
    %cst = arith.constant 0.000000e+00 : f32
    %54 = vector.broadcast %cst : f32 to vector<8x256xf32>
    %55 = arith.maximumf %53, %54 : vector<8x256xf32>
    %cst_35 = arith.constant dense<0.000000e+00> : vector<8xf32>
    %56 = vector.multi_reduction <add>, %55, %cst_35 [1] : vector<8x256xf32> to vector<8xf32>
    %57 = vector.shape_cast %56 : vector<8xf32> to vector<8x1xf32>
    %cst_36 = arith.constant 3.906250e-03 : f32
    %58 = vector.broadcast %cst_36 : f32 to vector<8x1xf32>
    %59 = arith.mulf %57, %58 : vector<8x1xf32>
    %60 = vector.broadcast %59 : vector<8x1xf32> to vector<8x2xf32>
    %61 = arith.mulf %19, %60 : vector<8x2xf32>
    %cst_37 = arith.constant dense<0.000000e+00> : vector<2xf32>
    %62 = vector.multi_reduction <add>, %61, %cst_37 [0] : vector<8x2xf32> to vector<2xf32>
    %63 = vector.shape_cast %62 : vector<2xf32> to vector<1x2xf32>
    %64 = arith.addf %63, %20 : vector<1x2xf32>
    %cst_38 = arith.constant 0.000000e+00 : f32
    %65 = vector.broadcast %cst_38 : f32 to vector<1x2xf32>
    %66 = arith.maximumf %64, %65 : vector<1x2xf32>
    %67 = vector.broadcast %66 : vector<1x2xf32> to vector<8x2xf32>
    %68 = arith.mulf %21, %67 : vector<8x2xf32>
    %cst_39 = arith.constant dense<0.000000e+00> : vector<8xf32>
    %69 = vector.multi_reduction <add>, %68, %cst_39 [1] : vector<8x2xf32> to vector<8xf32>
    %70 = vector.shape_cast %69 : vector<8xf32> to vector<8x1xf32>
    %71 = arith.addf %70, %22 : vector<8x1xf32>
    %72 = arith.negf %71 : vector<8x1xf32>
    %73 = math.exp %72 : vector<8x1xf32>
    %cst_40 = arith.constant 1.000000e+00 : f32
    %74 = vector.broadcast %cst_40 : f32 to vector<8x1xf32>
    %75 = arith.addf %74, %73 : vector<8x1xf32>
    %76 = arith.divf %74, %75 : vector<8x1xf32>
    %77 = vector.broadcast %76 : vector<8x1xf32> to vector<8x256xf32>
    %78 = arith.mulf %55, %77 : vector<8x256xf32>
    %79 = arith.truncf %78 : vector<8x256xf32> to vector<8x256xbf16>
    %cst_41 = arith.constant dense<0.000000e+00> : vector<8x256xf32>
    %80 = tpu.matmul %23, %79, %cst_41 {dimension_numbers = #tpu.dot_dimension_numbers<[1], [0], [0], [1], [0, 0, 1, 1], [], []>} : vector<8x8xbf16>, vector<8x256xbf16>, vector<8x256xf32> -> vector<8x256xf32>
    %81 = vector.broadcast %24 : vector<8x1xf32> to vector<8x256xf32>
    %82 = arith.addf %80, %81 : vector<8x256xf32>
    %cst_42 = arith.constant 0.000000e+00 : f32
    %83 = vector.broadcast %cst_42 : f32 to vector<8x256xf32>
    %84 = arith.maximumf %82, %83 : vector<8x256xf32>
    %85 = arith.addf %84, %26 : vector<8x256xf32>
    %c0_43 = arith.constant 0 : index
    %c0_44 = arith.constant 0 : index
    %c0_45 = arith.constant 0 : index
    %86 = vector.load %arg10[%c0_43, %c0_44, %c0_45] : memref<2x8x256xf32, #tpu.memory_space<vmem>>, vector<1x8x256xf32>
    %87 = vector.shape_cast %86 : vector<1x8x256xf32> to vector<8x256xf32>
    %88 = vector.shape_cast %85 : vector<8x256xf32> to vector<1x8x256xf32>
    tpu.vector_store %arg10[%c0_43, %c0_44, %c0_45], %88 {strides = array<i32>} : memref<2x8x256xf32, #tpu.memory_space<vmem>>, vector<1x8x256xf32>,
    %c1_46 = arith.constant 1 : index
    %c0_47 = arith.constant 0 : index
    %c0_48 = arith.constant 0 : index
    %89 = vector.load %arg1[%c1_46, %c0_47, %c0_48] : memref<2x8x256xf32, #tpu.memory_space<vmem>>, vector<1x8x256xf32>
    %90 = vector.shape_cast %89 : vector<1x8x256xf32> to vector<8x256xf32>
    %c17_i32_49 = arith.constant 17 : i32
    %91 = tpu.dynamic_rotate %90 by %c17_i32_49 dim 1 : vector<8x256xf32>, i32 -> vector<8x256xf32>
    %92 = arith.mulf %91, %1 : vector<8x256xf32>
    %c16_i32_50 = arith.constant 16 : i32
    %93 = tpu.dynamic_rotate %90 by %c16_i32_50 dim 1 : vector<8x256xf32>, i32 -> vector<8x256xf32>
    %94 = arith.mulf %93, %3 : vector<8x256xf32>
    %95 = arith.addf %92, %94 : vector<8x256xf32>
    %c15_i32_51 = arith.constant 15 : i32
    %96 = tpu.dynamic_rotate %90 by %c15_i32_51 dim 1 : vector<8x256xf32>, i32 -> vector<8x256xf32>
    %97 = arith.mulf %96, %5 : vector<8x256xf32>
    %98 = arith.addf %95, %97 : vector<8x256xf32>
    %c1_i32_52 = arith.constant 1 : i32
    %99 = tpu.dynamic_rotate %90 by %c1_i32_52 dim 1 : vector<8x256xf32>, i32 -> vector<8x256xf32>
    %100 = arith.mulf %99, %7 : vector<8x256xf32>
    %101 = arith.addf %98, %100 : vector<8x256xf32>
    %102 = arith.mulf %90, %9 : vector<8x256xf32>
    %103 = arith.addf %101, %102 : vector<8x256xf32>
    %c255_i32_53 = arith.constant 255 : i32
    %104 = tpu.dynamic_rotate %90 by %c255_i32_53 dim 1 : vector<8x256xf32>, i32 -> vector<8x256xf32>
    %105 = arith.mulf %104, %11 : vector<8x256xf32>
    %106 = arith.addf %103, %105 : vector<8x256xf32>
    %c241_i32_54 = arith.constant 241 : i32
    %107 = tpu.dynamic_rotate %90 by %c241_i32_54 dim 1 : vector<8x256xf32>, i32 -> vector<8x256xf32>
    %108 = arith.mulf %107, %13 : vector<8x256xf32>
    %109 = arith.addf %106, %108 : vector<8x256xf32>
    %c240_i32_55 = arith.constant 240 : i32
    %110 = tpu.dynamic_rotate %90 by %c240_i32_55 dim 1 : vector<8x256xf32>, i32 -> vector<8x256xf32>
    %111 = arith.mulf %110, %15 : vector<8x256xf32>
    %112 = arith.addf %109, %111 : vector<8x256xf32>
    %c239_i32_56 = arith.constant 239 : i32
    %113 = tpu.dynamic_rotate %90 by %c239_i32_56 dim 1 : vector<8x256xf32>, i32 -> vector<8x256xf32>
    %114 = arith.mulf %113, %17 : vector<8x256xf32>
    %115 = arith.addf %112, %114 : vector<8x256xf32>
    %116 = vector.broadcast %18 : vector<8x1xf32> to vector<8x256xf32>
    %117 = arith.addf %115, %116 : vector<8x256xf32>
    %cst_57 = arith.constant 0.000000e+00 : f32
    %118 = vector.broadcast %cst_57 : f32 to vector<8x256xf32>
    %119 = arith.maximumf %117, %118 : vector<8x256xf32>
    %cst_58 = arith.constant dense<0.000000e+00> : vector<8xf32>
    %120 = vector.multi_reduction <add>, %119, %cst_58 [1] : vector<8x256xf32> to vector<8xf32>
    %121 = vector.shape_cast %120 : vector<8xf32> to vector<8x1xf32>
    %cst_59 = arith.constant 3.906250e-03 : f32
    %122 = vector.broadcast %cst_59 : f32 to vector<8x1xf32>
    %123 = arith.mulf %121, %122 : vector<8x1xf32>
    %124 = vector.broadcast %123 : vector<8x1xf32> to vector<8x2xf32>
    %125 = arith.mulf %19, %124 : vector<8x2xf32>
    %cst_60 = arith.constant dense<0.000000e+00> : vector<2xf32>
    %126 = vector.multi_reduction <add>, %125, %cst_60 [0] : vector<8x2xf32> to vector<2xf32>
    %127 = vector.shape_cast %126 : vector<2xf32> to vector<1x2xf32>
    %128 = arith.addf %127, %20 : vector<1x2xf32>
    %cst_61 = arith.constant 0.000000e+00 : f32
    %129 = vector.broadcast %cst_61 : f32 to vector<1x2xf32>
    %130 = arith.maximumf %128, %129 : vector<1x2xf32>
    %131 = vector.broadcast %130 : vector<1x2xf32> to vector<8x2xf32>
    %132 = arith.mulf %21, %131 : vector<8x2xf32>
    %cst_62 = arith.constant dense<0.000000e+00> : vector<8xf32>
    %133 = vector.multi_reduction <add>, %132, %cst_62 [1] : vector<8x2xf32> to vector<8xf32>
    %134 = vector.shape_cast %133 : vector<8xf32> to vector<8x1xf32>
    %135 = arith.addf %134, %22 : vector<8x1xf32>
    %136 = arith.negf %135 : vector<8x1xf32>
    %137 = math.exp %136 : vector<8x1xf32>
    %cst_63 = arith.constant 1.000000e+00 : f32
    %138 = vector.broadcast %cst_63 : f32 to vector<8x1xf32>
    %139 = arith.addf %138, %137 : vector<8x1xf32>
    %140 = arith.divf %138, %139 : vector<8x1xf32>
    %141 = vector.broadcast %140 : vector<8x1xf32> to vector<8x256xf32>
    %142 = arith.mulf %119, %141 : vector<8x256xf32>
    %143 = arith.truncf %142 : vector<8x256xf32> to vector<8x256xbf16>
    %cst_64 = arith.constant dense<0.000000e+00> : vector<8x256xf32>
    %144 = tpu.matmul %23, %143, %cst_64 {dimension_numbers = #tpu.dot_dimension_numbers<[1], [0], [0], [1], [0, 0, 1, 1], [], []>} : vector<8x8xbf16>, vector<8x256xbf16>, vector<8x256xf32> -> vector<8x256xf32>
    %145 = vector.broadcast %24 : vector<8x1xf32> to vector<8x256xf32>
    %146 = arith.addf %144, %145 : vector<8x256xf32>
    %cst_65 = arith.constant 0.000000e+00 : f32
    %147 = vector.broadcast %cst_65 : f32 to vector<8x256xf32>
    %148 = arith.maximumf %146, %147 : vector<8x256xf32>
    %149 = arith.addf %148, %90 : vector<8x256xf32>
    %c1_66 = arith.constant 1 : index
    %c0_67 = arith.constant 0 : index
    %c0_68 = arith.constant 0 : index
    %150 = vector.load %arg10[%c1_66, %c0_67, %c0_68] : memref<2x8x256xf32, #tpu.memory_space<vmem>>, vector<1x8x256xf32>
    %151 = vector.shape_cast %150 : vector<1x8x256xf32> to vector<8x256xf32>
    %152 = vector.shape_cast %149 : vector<8x256xf32> to vector<1x8x256xf32>
    tpu.vector_store %arg10[%c1_66, %c0_67, %c0_68], %152 {strides = array<i32>} : memref<2x8x256xf32, #tpu.memory_space<vmem>>, vector<1x8x256xf32>,
    return
  }
  func.func @transform_0(%arg0: i32) -> (i32, i32, i32) {
    %c0_i32 = arith.constant 0 : i32
    %c0_i32_0 = arith.constant 0 : i32
    %c0_i32_1 = arith.constant 0 : i32
    return %arg0, %c0_i32, %c0_i32_0 : i32, i32, i32
  }
  func.func @transform_1(%arg0: i32) -> (i32, i32, i32) {
    %c0_i32 = arith.constant 0 : i32
    %c0_i32_0 = arith.constant 0 : i32
    %c0_i32_1 = arith.constant 0 : i32
    %c0_i32_2 = arith.constant 0 : i32
    return %c0_i32, %c0_i32_0, %c0_i32_1 : i32, i32, i32
  }
  func.func @transform_2(%arg0: i32) -> (i32, i32) {
    %c0_i32 = arith.constant 0 : i32
    %c0_i32_0 = arith.constant 0 : i32
    %c0_i32_1 = arith.constant 0 : i32
    return %c0_i32, %c0_i32_0 : i32, i32
  }
  func.func @transform_3(%arg0: i32) -> (i32, i32) {
    %c0_i32 = arith.constant 0 : i32
    %c0_i32_0 = arith.constant 0 : i32
    %c0_i32_1 = arith.constant 0 : i32
    return %c0_i32, %c0_i32_0 : i32, i32
  }
  func.func @transform_4(%arg0: i32) -> (i32, i32) {
    %c0_i32 = arith.constant 0 : i32
    %c0_i32_0 = arith.constant 0 : i32
    %c0_i32_1 = arith.constant 0 : i32
    return %c0_i32, %c0_i32_0 : i32, i32
  }
  func.func @transform_5(%arg0: i32) -> (i32, i32) {
    %c0_i32 = arith.constant 0 : i32
    %c0_i32_0 = arith.constant 0 : i32
    %c0_i32_1 = arith.constant 0 : i32
    return %c0_i32, %c0_i32_0 : i32, i32
  }
  func.func @transform_6(%arg0: i32) -> (i32, i32) {
    %c0_i32 = arith.constant 0 : i32
    %c0_i32_0 = arith.constant 0 : i32
    %c0_i32_1 = arith.constant 0 : i32
    return %c0_i32, %c0_i32_0 : i32, i32
  }
  func.func @transform_7(%arg0: i32) -> (i32, i32) {
    %c0_i32 = arith.constant 0 : i32
    %c0_i32_0 = arith.constant 0 : i32
    %c0_i32_1 = arith.constant 0 : i32
    return %c0_i32, %c0_i32_0 : i32, i32
  }
  func.func @transform_8(%arg0: i32) -> (i32, i32) {
    %c0_i32 = arith.constant 0 : i32
    %c0_i32_0 = arith.constant 0 : i32
    %c0_i32_1 = arith.constant 0 : i32
    return %c0_i32, %c0_i32_0 : i32, i32
  }
  func.func @transform_9(%arg0: i32) -> (i32, i32, i32) {
    %c0_i32 = arith.constant 0 : i32
    %c0_i32_0 = arith.constant 0 : i32
    %c0_i32_1 = arith.constant 0 : i32
    return %arg0, %c0_i32, %c0_i32_0 : i32, i32, i32
  }
}

</mosaic_0001>

<bundles_post_ra>
// kernel: tpu_custom_call.1
= control target key start
LH: loop header
LB: loop body
LE: loop exit
PB: predicated region body
PF: predicated region fallthrough
CT: control target
= control target key end

     0   :  { %14 = vsyncpa [#allocation3], 0  ;;  %s1618_s0 = inlined_call_operand.hbm [shape: f32[4,8,256], index: 0, kind: input, shape index: {}]   ;;  %s1619_s1 = inlined_call_operand.hbm [shape: f32[9,8,256], index: 1, kind: input, shape index: {}]   ;;  %s1620_s2 = inlined_call_operand.vmem [shape: f32[8,1], index: 2, kind: input, shape index: {}]   ;;  %s1621_s3 = inlined_call_operand.vmem [shape: f32[8,2], index: 3, kind: input, shape index: {}]   ;;  %s1622_s4 = inlined_call_operand.vmem [shape: f32[1,2], index: 4, kind: input, shape index: {}]   ;;  %s1623_s5 = inlined_call_operand.vmem [shape: f32[8,2], index: 5, kind: input, shape index: {}]   ;;  %s1624_s6 = inlined_call_operand.vmem [shape: f32[8,1], index: 6, kind: input, shape index: {}]   ;;  %s1625_s7 = inlined_call_operand.vmem [shape: bf16[8,8], index: 7, kind: input, shape index: {}]   ;;  %s1626_s8 = inlined_call_operand.vmem [shape: f32[8,1], index: 8, kind: input, shape index: {}]   ;;  %s1627_s9 = inlined_call_operand.hbm [shape: f32[4,8,256], index: 9, kind: output, shape index: {}]  }
   0x1   :  { %16 = vsyncpa [#allocation3 + $0x1], 0 }
   0x2   :  { %17 = vsyncpa [#allocation6], 0 }
   0x3   :  { %18 = vsyncpa [#allocation4], 0 }
   0x4   :  { %20 = vsyncpa [#allocation4 + $0x1], 0  ;;  %s1193_s30 = smov 0   ;;  %s1195_s10 = smov 0  }
   0x5   :  { %s1197_s11 = smov 0   ;;  %s1199_s12 = smov 0  }
   0x6 LB: > { %s1214_s13 = sadd.s32 4294967295, %s1126_s12   ;;  %s887_s14 = sadd.s32 4294967294, %s1126_s12   ;;  %s1126_s12 = sphi %s1199_s12, %s1652_s12   ;;  %s1122_s11 = sphi %s1197_s11, %s1655_s11   ;;  %s1118_s10 = sphi %s1195_s10, %s1654_s10   ;;  %s1114_s30 = sphi %s1193_s30, %s1653_s30  }
   0x7   : > { %p46_p0 = scmp.ne.s32.totalorder %s1118_s10, %s1114_s30  ;;  %p1628_p1 = scmp.eq.s32.totalorder %s1214_s13, 0 }
   0x8   : > { %p244_p3 = scmp.eq.s32.totalorder %s887_s14, 1  ;;  %p888_p5 = scmp.ge.s32.totalorder %s1126_s12, 1 }
   0x9   : > { %p1223_p4 = por %p1628_p1, %p46_p0  ;;  %p251_p7 = scmp.lt.s32.totalorder %s1126_s12, 3 }
   0xa   : > { %p1228_p6 = por %p244_p3, %p46_p0  ;;  %s1128_s18 = smov [#allocation5]  }
   0xb   : > { %s1635_s15 = scalar_select %p1223_p4, 1, 0 }
   0xc   : > { %s1636_s16 = scalar_select %p1228_p6, 1, 0 }
   0xd   : > { %p1233_p8 = pnand %p888_p5, %p251_p7  ;;  %s263_s19 = sshll.u32 %s1128_s18, 4  ;;  %s1237_s19 = int_to_ptr.vmem [resolvable:$true] %s263_s19 }
   0xe   : > { %1637 = sst [smem:[#allocation11_spill]] %s1636_s16  ;;  %s1249_s21 = sadd.s32 1, %s1126_s12  }
   0xf   : > { %s1638_s17 = scalar_select %p1233_p8, 1, 0 }
  0x10   : > { %p927_p9 = pneg %p1233_p8  ;;  %1640 = sst [smem:[#allocation12_spill]] %s1249_s21 }
  0x11   : > { %s33_s22 = sadd.s32 1, %s1122_s11  ;;  %s30_s23 = ssub.s32 %s1126_s12, %s1249_s21 }
  0x12   : > { %p1244_p11 = pnand %p927_p9, %p1628_p1  ;;  %s998_s26 = scalar_lea.hbm %s1619_s1, 2304 }
  0x13   : > { %p999_p12 = scmp.ne.s32.totalorder %s1619_s1, %s998_s26  ;;  %p1005_p5 = scmp.lt.u32.totalorder %s998_s26, %s1619_s1 }
  0x14   : > { %p1000_p13 = pneg %p1244_p11 }
  0x16   : > { %p1001_p0 = pnand %p1000_p13, %p999_p12 }
  0x18   : > { %p1002_p3 = pneg %p1001_p0 }
  0x1a   : > { %p1007_p7 = pnand %p1005_p5, %p1002_p3 }
  0x1c   : > { %1010 = shalt.err (!%p1007_p7)
}
  0x1d   : > { %s1011_s18 = scalar_lea.vmem %s1237_s19, 2304  ;;  %p1019_p2 = scmp.lt.s32.totalorder %s1237_s19, %s1237_s19 }
  0x1e   : > { %p1012_p9 = scmp.ne.s32.totalorder %s1237_s19, %s1011_s18  ;;  %p1020_p6 = scmp.lt.s32.totalorder %s1011_s18, %s1011_s18 }
  0x20   : > { %p1014_p10 = pnand %p1012_p9, %p1000_p13  ;;  %p1021_p4 = por %p1020_p6, %p1019_p2 }
  0x22   : > { %p1015_p1 = pneg %p1014_p10 }
  0x24   : > { %p1022_p8 = pnand %p1021_p4, %p1015_p1 }
  0x26   : > { %1025 = shalt.err (!%p1022_p8)
}
  0x27   : > { %s1634_s24 = smov 256   ;;  %s1130_s25 = smov 16  }
  0x28   : > { %930 = dma.hbm_to_vmem [thread:$0]  (!%p1244_p11), %s1619_s1, 2304, %s1237_s19, [#allocation6], %s1634_s24, %s1634_s24, %s1130_s25  }
  0x29   : > { %p31_p1 = scmp.eq.s32.totalorder %s30_s23, 0  ;;  %p40_p2 = scmp.ne.s32.totalorder %s1122_s11, %s1118_s10 }
  0x2a   : > { %p41_p4 = scmp.eq.s32.totalorder %s1126_s12, 0  ;;  %p940_p6 = scmp.lt.s32.totalorder %s1126_s12, 2 }
  0x2b   : > { %s1283_s28 = scalar_select %p31_p1, %s1122_s11, %s33_s22  }
  0x2c   : > { %p42_p8 = por %p41_p4, %p40_p2  ;;  %p1641_p10 = scmp.eq.s32.totalorder %s1214_s13, 1 }
  0x2d   : > { %s298_s20 = sand.u32 1, %s1122_s11   ;;  %s916_s14 = sshll.u32 %s1126_s12, 9 }
  0x2e   : > { %p1287_p12 = por %p1641_p10, %p40_p2  ;;  %s891_s18 = sshll.u32 %s298_s20, 5 }
  0x2f   : > { %s1296_s26 = scalar_lea.hbm %s1618_s0, %s916_s14  ;;  %s302_s19 = scalar_lea.vmem [#allocation2], %s891_s18 }
  0x30   : > { %s310_s22 = sshll.u32 %s302_s19, 4  ;;  %p1298_p11 = pnand %p940_p6, %p42_p8  ;;  %s1302_s22 = int_to_ptr.vmem [resolvable:$true] %s310_s22 }
  0x31   : > { %s1304_s27 = scalar_lea.sflag [#allocation3], %s298_s20  ;;  %s1026_s24 = scalar_lea.hbm %s1296_s26, 512 }
  0x32   : > { %p1027_p13 = scmp.ne.s32.totalorder %s1296_s26, %s1026_s24  ;;  %p1028_p0 = pneg %p1298_p11 }
  0x33   : > { %s1031_s14 = scalar_lea.hbm %s1618_s0, 1024  ;;  %p1032_p7 = scmp.lt.u32.totalorder %s1296_s26, %s1618_s0 }
  0x34   : > { %p1029_p3 = pnand %p1028_p0, %p1027_p13  ;;  %p1033_p9 = scmp.lt.u32.totalorder %s1031_s14, %s1026_s24 }
  0x35   : > { %p1035_p2 = scmp.lt.u32.totalorder %s1026_s24, %s1296_s26 }
  0x36   : > { %p1030_p5 = pneg %p1029_p3  ;;  %p1034_p1 = por %p1033_p9, %p1032_p7 }
  0x38   : > { %p1036_p4 = por %p1035_p2, %p1034_p1 }
  0x3a   : > { %p1037_p6 = pnand %p1036_p4, %p1030_p5 }
  0x3c   : > { %1040 = shalt.err (!%p1037_p6)
}
  0x3d   : > { %s1041_s20 = scalar_lea.vmem %s1302_s22, 512  ;;  %s1131_s16 = smov [#allocation2]  }
  0x3e   : > { %p1042_p8 = scmp.ne.s32.totalorder %s1302_s22, %s1041_s20  ;;  %s1046_s21 = sshll.u32 %s1131_s16, 4  ;;  %s1047_s21 = int_to_ptr.vmem [resolvable:$false] %s1046_s21 }
  0x3f   : > { %s1048_s18 = scalar_lea.vmem %s1047_s21, 1024  ;;  %p1049_p3 = scmp.lt.s32.totalorder %s1302_s22, %s1047_s21 }
  0x40   : > { %p1044_p10 = pnand %p1042_p8, %p1028_p0  ;;  %p1050_p7 = scmp.lt.s32.totalorder %s1048_s18, %s1041_s20 }
  0x42   : > { %p1045_p13 = pneg %p1044_p10  ;;  %p1051_p9 = por %p1050_p7, %p1049_p3 }
  0x44   : > { %p1052_p1 = pnand %p1051_p9, %p1045_p13 }
  0x46   : > { %1055 = shalt.err (!%p1052_p1)
}
  0x47   : > { %s1644_s24 = smov 256   ;;  %p1645_p0 = scmp.ne.s32.totalorder %s1638_s17, 0 }
  0x48   : > { %934 = dma.hbm_to_vmem [thread:$0]  (!%p1298_p11), %s1296_s26, 512, %s1302_s22, %s1304_s27, %s1644_s24, %s1644_s24, %s1130_s25  }
  0x49   : > { %322 = sbr.rel (%p1645_p0) target bundleno = 994 (0x3e2), region = 56  ;;  %s1338_s14 = sand.u32 (!%p1645_p0), 1, %s1118_s10  }
  0x4a   : > { %s896_s19 = sshll.u32 (!%p1645_p0), %s1338_s14, 5  ;;  %s325_s20 = scalar_lea.sflag (!%p1645_p0), [#allocation3], %s1338_s14 }
  0x4b   : > { %s328_s23 = scalar_lea.vmem (!%p1645_p0), [#allocation2], %s896_s19  ;;  %p1646_p5 = scmp.ne.s32.totalorder (!%p1645_p0), %s1635_s15, 0 }
  0x50   : > { %1101 = dma.done.wait (%p1646_p5), %s325_s20, 512  }
  0x51   : > { %1103 = vsyncadd (%p1646_p5), %s325_s20, 4294966784  ;;  %p1647_p11 = scmp.eq.s32.totalorder %s1214_s13, 0 }
  0x53   : > { %1105 = dma.done.wait (%p1647_p11), [#allocation6], 2304   ;;  %p1648_p2 = pmov %p1647_p11 }
  0x54   : > { %v1132_v0 = vmov 0   ;;  %v1352_v1 = vld [vmem:[%s328_s23] sm:$0xff]  ;;  %s1133_s17 = smov 16   ;;  %s1134_s25 = smov 17   ;;  %v1357_v2 = vld [vmem:[%s328_s23 + $0x8] sm:$0xff]  ;;  %v1362_v3 = vld [vmem:[%s328_s23 + $0x18] sm:$0xff]  ;;  %v409_v23 = vlaneseq }
  0x55   : > { %1107 = vsyncadd (%p1648_p2), [#allocation6], 4294964992  ;;  %988 = vset.pattern.permute.xlu0 %v1132_v0  ;;  %989 = vset.pattern.permute.xlu1 %v1132_v0  ;;  %v1364_v4 = vld [vmem:[%s328_s23 + $0x10] sm:$0xff]  ;;  %s1135_s15 = smov 15   ;;  %s1136_s26 = smov 1   ;;  %v396_v5 = vld [vmem:[%s1620_s2] sm:$0xff] }
  0x56   : > { %593 = vmatprep.mubr.bf16.mxu0 %v1132_v0  ;;  %773 = vmatprep.mubr.bf16.mxu1 %v1132_v0  ;;  %s1137_s22 = smov 127   ;;  %s1138_s27 = smov 113   ;;  %v1406_v26 = vand.u32 127, %v409_v23  ;;  %v373_v30 = vld [vmem:[#allocation5 + $0x10] sm:$0xff]  ;;  %v374_v31 = vld [vmem:[#allocation5 + $0x18] sm:$0xff]  ;;  %v370_v34 = vld [vmem:[#allocation5] sm:$0xff] }
  0x57   : > { %416 = vrot.lane.b32.xlu1 %v1352_v1, %s1133_s17  ;;  %405 = vrot.lane.b32.xlu0 %v1352_v1, %s1134_s25  ;;  %s1139_s16 = smov 112   ;;  %s1140_s24 = smov 111   ;;  %v371_v35 = vld [vmem:[#allocation5 + $0x8] sm:$0xff]  ;;  %v376_v46 = vld [vmem:[#allocation5 + $0x20] sm:$0xff]  ;;  %v379_v56 = vld [vmem:[#allocation5 + $0x30] sm:$0xff]  ;;  %vm511_vm8 = vcmask 15360  }
  0x58   : > { %vm420_vm0 = vcmp.lt.s32.totalorder %v1406_v26, 16  ;;  %vm411_vm1 = vcmp.lt.s32.totalorder %v1406_v26, 17  ;;  %vm431_vm2 = vcmp.lt.s32.totalorder %v1406_v26, 15  ;;  %vm442_vm3 = vcmp.lt.s32.totalorder %v1406_v26, 1  ;;  %v377_v47 = vld [vmem:[#allocation5 + $0x28] sm:$0xff]  ;;  %v380_v57 = vld [vmem:[#allocation5 + $0x38] sm:$0xff] }
  0x59   : > { %v382_v0 = vld [vmem:[#allocation5 + $0x40] sm:$0xff]  ;;  %vm457_vm4 = vcmp.lt.s32.totalorder %v1406_v26, 127  ;;  %vm468_vm5 = vcmp.lt.s32.totalorder %v1406_v26, 113  ;;  %vm479_vm6 = vcmp.lt.s32.totalorder %v1406_v26, 112  ;;  %vm490_vm7 = vcmp.lt.s32.totalorder %v1406_v26, 111  ;;  %s366_s23 = scalar_lea.vmem [#allocation7], %s896_s19 }
  0x5a   : > { %vm554_vm9 = vcmask 1043456   ;;  %vm550_vm10 = vcmask 64512  }
  0x5b   : > { %418 = vrot.lane.b32.xlu1 %v1357_v2, %s1133_s17  ;;  %407 = vrot.lane.b32.xlu0 %v1357_v2, %s1134_s25 }
  0x5f   : > { %613 = vrot.lane.b32.xlu1 %v1362_v3, %s1134_s25  ;;  %611 = vrot.lane.b32.xlu0 %v1364_v4, %s1134_s25  ;;  %s804_s25 = sshll.u32 %s366_s23, 4  ;;  %s1566_s25 = int_to_ptr.vmem [resolvable:$true] %s804_s25 }
  0x63   : > { %621 = vrot.lane.b32.xlu1 %v1362_v3, %s1133_s17  ;;  %619 = vrot.lane.b32.xlu0 %v1364_v4, %s1133_s17 }
  0x67   : > { %429 = vrot.lane.b32.xlu1 %v1357_v2, %s1135_s15  ;;  %427 = vrot.lane.b32.xlu0 %v1352_v1, %s1135_s15 }
  0x6b   : > { %631 = vrot.lane.b32.xlu1 %v1362_v3, %s1135_s15  ;;  %629 = vrot.lane.b32.xlu0 %v1364_v4, %s1135_s15  ;;  %s918_s15 = sshll.u32 %s1214_s13, 9  ;;  %s1056_s13 = scalar_lea.vmem %s1566_s25, 512 }
  0x6c   : > { %p1057_p4 = scmp.ne.s32.totalorder %s1566_s25, %s1056_s13 }
  0x6e   : > { %p1058_p6 = pnand %p1057_p4, %p1287_p12 }
  0x6f   : > { %440 = vrot.lane.b32.xlu1 %v1357_v2, %s1136_s26  ;;  %438 = vrot.lane.b32.xlu0 %v1352_v1, %s1136_s26 }
  0x70   : > { %p1059_p8 = pneg %p1058_p6 }
  0x73   : > { %641 = vrot.lane.b32.xlu1 %v1362_v3, %s1136_s26  ;;  %639 = vrot.lane.b32.xlu0 %v1364_v4, %s1136_s26 }
  0x77   : > { %455 = vrot.lane.b32.xlu1 %v1357_v2, %s1137_s22  ;;  %453 = vrot.lane.b32.xlu0 %v1352_v1, %s1137_s22 }
  0x7b   : > { %655 = vrot.lane.b32.xlu1 %v1362_v3, %s1137_s22  ;;  %653 = vrot.lane.b32.xlu0 %v1364_v4, %s1137_s22  ;;  %s1573_s22 = scalar_lea.hbm %s1627_s9, %s918_s15 }
  0x7f   : > { %466 = vrot.lane.b32.xlu1 %v1357_v2, %s1138_s27  ;;  %464 = vrot.lane.b32.xlu0 %v1352_v1, %s1138_s27 }
  0x83   : > { %665 = vrot.lane.b32.xlu1 %v1362_v3, %s1138_s27  ;;  %663 = vrot.lane.b32.xlu0 %v1364_v4, %s1138_s27  ;;  %s790_s27 = scalar_lea.sflag [#allocation4], %s1338_s14 }
  0x87   : > { %477 = vrot.lane.b32.xlu1 %v1357_v2, %s1139_s16  ;;  %475 = vrot.lane.b32.xlu0 %v1352_v1, %s1139_s16 }
  0x8b   : > { %673 = vrot.lane.b32.xlu1 %v1364_v4, %s1139_s16  ;;  %499 = vperm.xlu0 %988, %v396_v5  }
  0x8f   : > { %675 = vrot.lane.b32.xlu1 %v1362_v3, %s1139_s16  ;;  %486 = vrot.lane.b32.xlu0 %v1352_v1, %s1140_s24  ;;  %s1141_s16 = smov [#allocation7]  }
  0x90   : > { %s1060_s21 = sshll.u32 %s1141_s16, 4  ;;  %s1061_s21 = int_to_ptr.vmem [resolvable:$false] %s1060_s21 }
  0x91   : > { %s1062_s18 = scalar_lea.vmem %s1061_s21, 1024  ;;  %p1063_p10 = scmp.lt.s32.totalorder %s1566_s25, %s1061_s21 }
  0x92   : > { %p1064_p13 = scmp.lt.s32.totalorder %s1062_s18, %s1056_s13 }
  0x93   : > { %488 = vrot.lane.b32.xlu1 %v1357_v2, %s1140_s24  ;;  %683 = vrot.lane.b32.xlu0 %v1364_v4, %s1140_s24 }
  0x94   : > { %p1065_p3 = por %p1064_p13, %p1063_p10 }
  0x96   : > { %p1066_p7 = pnand %p1065_p3, %p1059_p8 }
  0x97   : > { %685 = vrot.lane.b32.xlu1 %v1362_v3, %s1140_s24 }
  0xc9   : > { %v417_v6 = vpop.permute.xlu1 %416  ;;  %v406_v7 = vpop.permute.xlu0 %405 }
  0xcd   : > { %v419_v8 = vpop.permute.xlu1 %418  ;;  %v408_v9 = vpop.permute.xlu0 %407 }
  0xce   : > { %v421_v32 = vsel %vm420_vm0, %v417_v6, %v419_v8  ;;  %v422_v33 = vsel %vm420_vm0, %v419_v8, %v417_v6  ;;  %v412_v36 = vsel %vm411_vm1, %v406_v7, %v408_v9  ;;  %v413_v37 = vsel %vm411_vm1, %v408_v9, %v406_v7 }
  0xcf   : > { %v423_v38 = vmul.f32 %v422_v33, %v373_v30  ;;  %v424_v39 = vmul.f32 %v421_v32, %v374_v31  ;;  %v414_v50 = vmul.f32 %v413_v37, %v370_v34  ;;  %v415_v51 = vmul.f32 %v412_v36, %v371_v35  ;;  %v385_v36 = vld [vmem:[#allocation5 + $0x50] sm:$0xff]  ;;  %v386_v37 = vld [vmem:[#allocation5 + $0x58] sm:$0xff] }
  0xd1   : > { %v614_v10 = vpop.permute.xlu1 %613  ;;  %v612_v11 = vpop.permute.xlu0 %611  ;;  %v425_v9 = vadd.f32 %v423_v38, %v414_v50  ;;  %v388_v50 = vld [vmem:[#allocation5 + $0x60] sm:$0xff] }
  0xd2   : > { %v615_v44 = vsel %vm411_vm1, %v612_v11, %v614_v10  ;;  %v616_v45 = vsel %vm411_vm1, %v614_v10, %v612_v11  ;;  %v426_v10 = vadd.f32 %v424_v39, %v415_v51  ;;  %v389_v51 = vld [vmem:[#allocation5 + $0x68] sm:$0xff] }
  0xd3   : > { %v617_v60 = vmul.f32 %v616_v45, %v370_v34  ;;  %v618_v61 = vmul.f32 %v615_v44, %v371_v35 }
  0xd5   : > { %v622_v12 = vpop.permute.xlu1 %621  ;;  %v620_v13 = vpop.permute.xlu0 %619 }
  0xd6   : > { %v623_v40 = vsel %vm420_vm0, %v620_v13, %v622_v12  ;;  %v624_v41 = vsel %vm420_vm0, %v622_v12, %v620_v13  ;;  %v383_v13 = vld [vmem:[#allocation5 + $0x48] sm:$0xff] }
  0xd7   : > { %v625_v54 = vmul.f32 %v624_v41, %v373_v30  ;;  %v626_v55 = vmul.f32 %v623_v40, %v374_v31  ;;  %v649_v40 = vmul.f32 %v1364_v4, %v382_v0  ;;  %v650_v41 = vmul.f32 %v1362_v3, %v383_v13 }
  0xd9   : > { %v430_v14 = vpop.permute.xlu1 %429  ;;  %v428_v15 = vpop.permute.xlu0 %427 }
  0xda   : > { %v432_v48 = vsel %vm431_vm2, %v428_v15, %v430_v14  ;;  %v433_v49 = vsel %vm431_vm2, %v430_v14, %v428_v15 }
  0xdb   : > { %v434_v62 = vmul.f32 %v433_v49, %v376_v46  ;;  %v435_v63 = vmul.f32 %v432_v48, %v377_v47 }
  0xdd   : > { %v632_v16 = vpop.permute.xlu1 %631  ;;  %v630_v17 = vpop.permute.xlu0 %629  ;;  %v437_v30 = vadd.f32 %v435_v63, %v426_v10 }
  0xde   : > { %v633_v52 = vsel %vm431_vm2, %v630_v17, %v632_v16  ;;  %v634_v53 = vsel %vm431_vm2, %v632_v16, %v630_v17  ;;  %v627_v16 = vadd.f32 %v625_v54, %v617_v60  ;;  %v628_v17 = vadd.f32 %v626_v55, %v618_v61 }
  0xdf   : > { %v635_v5 = vmul.f32 %v634_v53, %v376_v46  ;;  %v636_v6 = vmul.f32 %v633_v52, %v377_v47 }
  0xe1   : > { %v441_v18 = vpop.permute.xlu1 %440  ;;  %v439_v19 = vpop.permute.xlu0 %438  ;;  %v637_v33 = vadd.f32 %v635_v5, %v627_v16  ;;  %v638_v34 = vadd.f32 %v636_v6, %v628_v17  ;;  %v395_v16 = vld [vmem:[#allocation5 + $0x88] sm:$0xff] }
  0xe2   : > { %v443_v58 = vsel %vm442_vm3, %v439_v19, %v441_v18  ;;  %v444_v59 = vsel %vm442_vm3, %v441_v18, %v439_v19  ;;  %v449_v18 = vmul.f32 %v1352_v1, %v382_v0  ;;  %v436_v19 = vadd.f32 %v434_v62, %v425_v9 }
  0xe3   : > { %v445_v11 = vmul.f32 %v444_v59, %v379_v56  ;;  %v446_v12 = vmul.f32 %v443_v58, %v380_v57 }
  0xe5   : > { %v642_v20 = vpop.permute.xlu1 %641  ;;  %v640_v21 = vpop.permute.xlu0 %639  ;;  %v448_v35 = vadd.f32 %v446_v12, %v437_v30 }
  0xe6   : > { %v643_v7 = vsel %vm442_vm3, %v640_v21, %v642_v20  ;;  %v644_v8 = vsel %vm442_vm3, %v642_v20, %v640_v21  ;;  %v450_v20 = vmul.f32 %v1357_v2, %v383_v13  ;;  %v447_v21 = vadd.f32 %v445_v11, %v436_v19  ;;  %v394_v13 = vld [vmem:[#allocation5 + $0x80] sm:$0xff] }
  0xe7   : > { %v645_v31 = vmul.f32 %v644_v8, %v379_v56  ;;  %v646_v32 = vmul.f32 %v643_v7, %v380_v57  ;;  %v391_v56 = vld [vmem:[#allocation5 + $0x70] sm:$0xff]  ;;  %v392_v57 = vld [vmem:[#allocation5 + $0x78] sm:$0xff] }
  0xe8   : > { %v451_v54 = vadd.f32 %v449_v18, %v447_v21  ;;  %v452_v55 = vadd.f32 %v450_v20, %v448_v35 }
  0xe9   : > { %v1399_v22 = vpop.permute.xlu1 %455  ;;  %v1403_v25 = vpop.permute.xlu0 %453  ;;  %v647_v44 = vadd.f32 %v645_v31, %v637_v33  ;;  %v648_v45 = vadd.f32 %v646_v32, %v638_v34 }
  0xea   : > { %v458_v38 = vsel %vm457_vm4, %v1403_v25, %v1399_v22  ;;  %v459_v39 = vsel %vm457_vm4, %v1399_v22, %v1403_v25 }
  0xeb   : > { %v460_v25 = vmul.f32 %v458_v38, %v385_v36  ;;  %v461_v49 = vmul.f32 %v459_v39, %v386_v37  ;;  %v651_v6 = vadd.f32 %v649_v40, %v647_v44  ;;  %v652_v7 = vadd.f32 %v650_v41, %v648_v45 }
  0xed   : > { %v1401_v24 = vpop.permute.xlu1 %655  ;;  %v1411_v28 = vpop.permute.xlu0 %653  ;;  %v462_v0 = vadd.f32 %v460_v25, %v451_v54  ;;  %v463_v5 = vadd.f32 %v461_v49, %v452_v55 }
  0xee   : > { %v657_v46 = vsel %vm457_vm4, %v1411_v28, %v1401_v24  ;;  %v658_v47 = vsel %vm457_vm4, %v1401_v24, %v1411_v28 }
  0xef   : > { %v659_v24 = vmul.f32 %v657_v46, %v385_v36  ;;  %v660_v28 = vmul.f32 %v658_v47, %v386_v37 }
  0xf1   : > { %v1408_v27 = vpop.permute.xlu1 %466  ;;  %v1430_v42 = vpop.permute.xlu0 %464  ;;  %v661_v17 = vadd.f32 %v659_v24, %v651_v6 }
  0xf2   : > { %v469_v52 = vsel %vm468_vm5, %v1430_v42, %v1408_v27  ;;  %v470_v53 = vsel %vm468_vm5, %v1408_v27, %v1430_v42 }
  0xf3   : > { %v471_v60 = vmul.f32 %v469_v52, %v388_v50  ;;  %v472_v61 = vmul.f32 %v470_v53, %v389_v51 }
  0xf5   : > { %v1413_v29 = vpop.permute.xlu1 %665  ;;  %v664_v14 = vpop.permute.xlu0 %663  ;;  %v474_v18 = vadd.f32 %v472_v61, %v463_v5 }
  0xf6   : > { %v667_v27 = vsel %vm468_vm5, %v664_v14, %v1413_v29  ;;  %v668_v42 = vsel %vm468_vm5, %v1413_v29, %v664_v14  ;;  %v662_v29 = vadd.f32 %v660_v28, %v652_v7  ;;  %v473_v14 = vadd.f32 %v471_v60, %v462_v0 }
  0xf7   : > { %v669_v11 = vmul.f32 %v667_v27, %v388_v50  ;;  %v670_v12 = vmul.f32 %v668_v42, %v389_v51 }
  0xf9   : > { %v1432_v43 = vpop.permute.xlu1 %477  ;;  %v476_v48 = vpop.permute.xlu0 %475  ;;  %v671_v36 = vadd.f32 %v669_v11, %v661_v17  ;;  %v672_v37 = vadd.f32 %v670_v12, %v662_v29  ;;  %v398_v11 = vld [vmem:[%s1622_s4] sm:$0x1] }
  0xfa   : > { %v480_v58 = vsel %vm479_vm6, %v476_v48, %v1432_v43  ;;  %v481_v59 = vsel %vm479_vm6, %v1432_v43, %v476_v48 }
  0xfb   : > { %v482_v8 = vmul.f32 %v480_v58, %v391_v56  ;;  %v483_v9 = vmul.f32 %v481_v59, %v392_v57 }
  0xfd   : > { %v674_v15 = vpop.permute.xlu1 %673  ;;  %v484_v34 = vadd.f32 %v482_v8, %v473_v14  ;;  %v485_v20 = vadd.f32 %v483_v9, %v474_v18 }
 0x101   : > { %v676_v22 = vpop.permute.xlu1 %675 }
 0x102   : > { %v677_v43 = vsel %vm479_vm6, %v674_v15, %v676_v22  ;;  %v678_v10 = vsel %vm479_vm6, %v676_v22, %v674_v15 }
 0x103   : > { %v679_v30 = vmul.f32 %v677_v43, %v391_v56  ;;  %v680_v31 = vmul.f32 %v678_v10, %v392_v57  ;;  %v397_v56 = vld [vmem:[%s1621_s3] sm:$0xff]  ;;  %v522_v10 = vshrl.u32 %v409_v23, 7 }
 0x105   : > { %v489_v63 = vpop.permute.xlu1 %488  ;;  %v681_v41 = vadd.f32 %v679_v30, %v671_v36  ;;  %v682_v44 = vadd.f32 %v680_v31, %v672_v37  ;;  %v523_v29 = vsub.s32 0, %v522_v10 }
 0x109   : > { %v686_v35 = vpop.permute.xlu1 %685 }
 0x10a   : > { %v500_v62 = vpop.permute.xlu0 %499 }
 0x10e   : > { %v487_v19 = vpop.permute.xlu0 %486 }
 0x10f   : > { %v491_v32 = vsel %vm490_vm7, %v487_v19, %v489_v63  ;;  %v492_v33 = vsel %vm490_vm7, %v489_v63, %v487_v19  ;;  %v399_v19 = vld [vmem:[%s1623_s5] sm:$0xff] }
 0x110   : > { %v493_v15 = vmul.f32 %v491_v32, %v394_v13  ;;  %v494_v21 = vmul.f32 %v492_v33, %v395_v16 }
 0x112   : > { %v495_v38 = vadd.f32 %v493_v15, %v484_v34  ;;  %v496_v39 = vadd.f32 %v494_v21, %v485_v20  ;;  %v684_v40 = vpop.permute.xlu0 %683  ;;  %v400_v21 = vld [vmem:[%s1624_s6] sm:$0xff] }
 0x113   : > { %v687_v45 = vsel %vm490_vm7, %v684_v40, %v686_v35  ;;  %v688_v46 = vsel %vm490_vm7, %v686_v35, %v684_v40 }
 0x114   : > { %v689_v47 = vmul.f32 %v687_v45, %v394_v13  ;;  %v690_v48 = vmul.f32 %v688_v46, %v395_v16  ;;  %v1510_v22 = vadd.f32 %v500_v62, %v495_v38  ;;  %v1512_v25 = vadd.f32 %v500_v62, %v496_v39 }
 0x116   : > { %v691_v49 = vadd.f32 %v689_v47, %v681_v41  ;;  %v692_v50 = vadd.f32 %v690_v48, %v682_v44  ;;  %v504_v51 = vmax.f32 %v1510_v22, 0.0  ;;  %v505_v52 = vmax.f32 %v1512_v25, 0.0  ;;  %v402_v48 = vld [vmem:[%s1626_s8] sm:$0xff] }
 0x117   : > { %v401_v22 = vld [vmem:[%s1625_s7] sm:$0xf] }
 0x118   : > { %v506_v53 = vadd.f32 %v505_v52, %v504_v51  ;;  %v1520_v54 = vadd.f32 %v691_v49, %v500_v62  ;;  %v1522_v26 = vadd.f32 %v692_v50, %v500_v62 }
 0x11a   : > { %507 = vadd.xlane.f32.xlu0 %v506_v53  ;;  %v695_v55 = vmax.f32 %v1520_v54, 0.0  ;;  %v696_v24 = vmax.f32 %v1522_v26, 0.0 }
 0x11c   : > { %v697_v28 = vadd.f32 %v696_v24, %v695_v55 }
 0x11e   : > { %698 = vadd.xlane.f32.xlu1 %v697_v28 }
 0x1a7   : > { %v508_v57 = vpop.xlane.xlu0 %507 }
 0x1a8   : > { %v509_v58 = vmul.f32 0.00390625, %v508_v57 }
 0x1aa   : > { %v510_v59 = vmul.f32 %v509_v58, %v397_v56 }
 0x1ab   : > { %v699_v60 = vpop.xlane.xlu1 %698 }
 0x1ac   : > { %v512_v61 = vsel %vm511_vm8, %v510_v59, 0.0  ;;  %v700_v27 = vmul.f32 0.00390625, %v699_v60 }
 0x1ad   : > { %v513_v42 = vrot.slane %v512_v61, 4 }
 0x1ae   : > { %v701_v62 = vmul.f32 %v700_v27, %v397_v56 }
 0x1af   : > { %v514_v63 = vadd.f32 %v513_v42, %v512_v61 }
 0x1b0   : > { %v702_v0 = vsel %vm511_vm8, %v701_v62, 0.0 }
 0x1b1   : > { %v515_v5 = vrot.slane %v514_v63, 2  ;;  %v703_v6 = vrot.slane %v702_v0, 4 }
 0x1b3   : > { %v516_v7 = vadd.f32 %v515_v5, %v514_v63  ;;  %v704_v8 = vadd.f32 %v703_v6, %v702_v0 }
 0x1b5   : > { %v517_v9 = vrot.slane %v516_v7, 1  ;;  %v705_v43 = vrot.slane %v704_v8, 2 }
 0x1b7   : > { %v706_v12 = vadd.f32 %v705_v43, %v704_v8  ;;  %v518_v13 = vadd.f32 %v517_v9, %v516_v7 }
 0x1b9   : > { %v707_v16 = vrot.slane %v706_v12, 1  ;;  %v519_v17 = vadd.f32 %v518_v13, %v398_v11 }
 0x1bb   : > { %v520_v14 = vmax.f32 %v519_v17, 0.0  ;;  %v708_v18 = vadd.f32 %v707_v16, %v706_v12 }
 0x1bd   : > { %v524_v30 = vrot.slane %v520_v14, %v523_v29  ;;  %v709_v31 = vadd.f32 %v708_v18, %v398_v11 }
 0x1bf   : > { %v525_v32 = vmul.f32 %v524_v30, %v399_v19  ;;  %v710_v33 = vmax.f32 %v709_v31, 0.0 }
 0x1c1   : > { %v526_v23 = vsel %vm511_vm8, %v525_v32, 0.0  ;;  %v714_v34 = vrot.slane %v710_v33, %v523_v29 }
 0x1c2   : > { %527 = vadd.xlane.f32.xlu0 %v526_v23 }
 0x1c3   : > { %v715_v20 = vmul.f32 %v714_v34, %v399_v19 }
 0x1c5   : > { %v716_v15 = vsel %vm511_vm8, %v715_v20, 0.0 }
 0x1c6   : > { %717 = vadd.xlane.f32.xlu0 %v716_v15 }
 0x24f   : > { %v528_v35 = vpop.xlane.xlu0 %527 }
 0x250   : > { %v529_v36 = vadd.f32 %v528_v35, %v400_v21 }
 0x252   : > { %v899_v37 = vmul.f32 -1.442695, %v529_v36 }
 0x253   : > { %v718_v38 = vpop.xlane.xlu0 %717 }
 0x254   : > { %990 = vpow2.f32 %v899_v37  ;;  %v719_v39 = vadd.f32 %v718_v38, %v400_v21 }
 0x256   : > { %v904_v40 = vmul.f32 -1.442695, %v719_v39 }
 0x258   : > { %992 = vpow2.f32 %v904_v40 }
 0x25e   : > { %v991_v41 = vpop.eup %990 }
 0x25f   : > { %v533_v44 = vadd.f32 1.0, %v991_v41 }
 0x261   : > { %994 = vrcp.f32 %v533_v44 }
 0x262   : > { %v993_v45 = vpop.eup %992 }
 0x263   : > { %v723_v46 = vadd.f32 1.0, %v993_v45 }
 0x265   : > { %996 = vrcp.f32 %v723_v46 }
 0x26b   : > { %v995_v47 = vpop.eup %994 }
 0x26c   : > { %538 = vperm.xlu1 %989, %v995_v47  }
 0x26f   : > { %v997_v49 = vpop.eup %996 }
 0x270   : > { %547 = vperm.xlu1 %989, %v402_v48   ;;  %728 = vperm.xlu0 %988, %v997_v49  }
 0x2eb   : > { %v539_v50 = vpop.permute.xlu1 %538 }
 0x2ec   : > { %v541_v53 = vmul.f32 %v539_v50, %v504_v51  ;;  %v542_v28 = vmul.f32 %v539_v50, %v505_v52 }
 0x2ee   : > { %v543_v56 = vpack.c.bf16 %v541_v53, %v541_v53  ;;  %v544_v57 = vpack.c.bf16 %v542_v28, %v542_v28 }
 0x2ef   : > { %v729_v58 = vpop.permute.xlu0 %728  ;;  %v548_v54 = vpop.permute.xlu1 %547 }
 0x2f0   : > { %v731_v59 = vmul.f32 %v729_v58, %v695_v55  ;;  %v732_v60 = vmul.f32 %v729_v58, %v696_v24  ;;  %900 = vmatprep.subr.msk.bf16.mxu0 %vm554_vm9, %v544_v57  ;;  %v556_v61 = vsel %vm554_vm9, %v543_v56, 0 }
 0x2f1   : > { %562 = vmatpush1.bf16.msra.mxu0 %v556_v61 }
 0x2f2   : > { %v733_v25 = vpack.c.bf16 %v731_v59, %v731_v59  ;;  %v734_v51 = vpack.c.bf16 %v732_v60, %v732_v60 }
 0x2f4   : > { %901 = vmatmul.mubr.msk.bf16.vlgmr.msra.gmra.mrb[0].mxu0 %vm550_vm10, %v401_v22  ;;  %905 = vmatprep.subr.msk.bf16.mxu1 %vm554_vm9, %v734_v51  ;;  %v736_v52 = vsel %vm554_vm9, %v733_v25, 0 }
 0x2f5   : > { %742 = vmatpush1.bf16.msra.mxu1 %v736_v52 }
 0x2f8   : > { %906 = vmatmul.mubr.msk.bf16.vlgmr.msra.gmra.mrb[0].mxu1 %vm550_vm10, %v401_v22 }
 0x3c7   : > { %v595_v55 = vpop.f32.mrb[0].mxu0 }
 0x3c8   : > { %v596_v26 = vadd.f32 %v595_v55, %v548_v54  ;;  %v597_v24 = vpop.f32.mrb[1].mxu0 }
 0x3c9   : > { %v598_v27 = vadd.f32 %v597_v24, %v548_v54  ;;  %v599_v42 = vpop.f32.mrb[2].mxu0 }
 0x3ca   : > { %v602_v62 = vmax.f32 %v596_v26, 0.0  ;;  %v600_v63 = vpop.f32.mrb[3].mxu0 }
 0x3cb   : > { %v603_v0 = vmax.f32 %v598_v27, 0.0  ;;  %v775_v5 = vpop.f32.mrb[0].mxu1 }
 0x3cc   : > { %v604_v6 = vadd.f32 %v602_v62, %v1352_v1  ;;  %v776_v7 = vadd.f32 %v775_v5, %v548_v54  ;;  %v777_v8 = vpop.f32.mrb[1].mxu1 }
 0x3cd   : > { %v605_v9 = vadd.f32 %v603_v0, %v1357_v2  ;;  %v778_v43 = vadd.f32 %v777_v8, %v548_v54  ;;  %v779_v10 = vpop.f32.mrb[2].mxu1 }
 0x3ce   : > { %606 = vst [vmem:[%s366_s23] sm:$0xff] %v604_v6  ;;  %v782_v11 = vmax.f32 %v776_v7, 0.0  ;;  %v780_v12 = vpop.f32.mrb[3].mxu1 }
 0x3cf   : > { %607 = vst [vmem:[%s366_s23 + $0x8] sm:$0xff] %v605_v9  ;;  %v783_v13 = vmax.f32 %v778_v43, 0.0 }
 0x3d0   : > { %v784_v1 = vadd.f32 %v1364_v4, %v782_v11 }
 0x3d1   : > { %v785_v16 = vadd.f32 %v1362_v3, %v783_v13 }
 0x3d2   : > { %907 = vst [vmem:[%s366_s23 + $0x10] sm:$0xff] %v784_v1 }
 0x3d3   : > { %908 = vst [vmem:[%s366_s23 + $0x18] sm:$0xff] %v785_v16 }
 0x3d4   : > { %1069 = shalt.err (!%p1066_p7)
}
 0x3d5   : > { %s1070_s24 = scalar_lea.hbm %s1573_s22, 512  ;;  %s1074_s15 = scalar_lea.hbm %s1627_s9, 1024 }
 0x3d6   : > { %p1071_p9 = scmp.ne.s32.totalorder %s1573_s22, %s1070_s24  ;;  %p1075_p5 = scmp.lt.u32.totalorder %s1573_s22, %s1627_s9 }
 0x3d7   : > { %p1076_p11 = scmp.lt.u32.totalorder %s1074_s15, %s1070_s24  ;;  %p1078_p4 = scmp.lt.u32.totalorder %s1070_s24, %s1573_s22 }
 0x3d8   : > { %p1072_p1 = pnand %p1071_p9, %p1287_p12 }
 0x3d9   : > { %p1077_p2 = por %p1076_p11, %p1075_p5 }
 0x3da   : > { %p1073_p0 = pneg %p1072_p1 }
 0x3db   : > { %p1079_p6 = por %p1078_p4, %p1077_p2 }
 0x3dd   : > { %p1080_p8 = pnand %p1079_p6, %p1073_p0 }
 0x3df   : > { %1083 = shalt.err (!%p1080_p8)
}
 0x3e0   : > { %s1142_s13 = smov 256  }
 0x3e1   : > { %925 = dma.vmem_to_hbm [thread:$0]  (%p1287_p12), %s1566_s25, 512, %s1573_s22, %s790_s27, %s1142_s13, %s1142_s13, %s1133_s17  }
 0x3e2 PF: > { %s1649_s16 = sld [smem:[#allocation11_spill]]  ;;  %s819_s21 = sand.u32 1, %s1114_s30  }
 0x3e3   : > { %p1651_p13 = scmp.ge.s32.totalorder %s1126_s12, 2  ;;  %s820_s18 = scalar_lea.sflag [#allocation4], %s819_s21 }
 0x3e8   : > { %p1650_p10 = scmp.ne.s32.totalorder %s1649_s16, 0 }
 0x3ea   : > { %p936_p3 = pnand %p1651_p13, %p1650_p10 }
 0x3ec   : > { %1109 = dma.done.wait (!%p936_p3), %s820_s18, 512  }
 0x3ed   : > { %1111 = vsyncadd (!%p936_p3), %s820_s18, 4294966784  ;;  %s1652_s12 = sld [smem:[#allocation12_spill]]  ;;  %s1653_s30 = smov %s1118_s10 }
 0x3ee   : > { %s1654_s10 = smov %s1122_s11  ;;  %s1655_s11 = smov %s1283_s28 }
 0x3f3   : > { %p23_p7 = scmp.ge.s32.totalorder %s1652_s12, 4  }
 0x3f5   :  { %25 = sbr.rel (!%p23_p7) target bundleno = 6 (0x6), region = 115 }
 0x3fc   :  { %825 = vsyncpa [#allocation3], 1 }
 0x3fd   :  { %827 = vsyncpa [#allocation3 + $0x1], 1 }
 0x3fe   :  { %828 = vsyncpa [#allocation6], 1 }
 0x3ff   :  { %829 = vsyncpa [#allocation4], 1 }
 0x400   :  { %831 = vsyncpa [#allocation4 + $0x1], 1 }

</bundles_post_ra>
